<compile_context>
chip_gen: v6e
topology: v6e:2x2x1
jax: 0.10.0
libtpu: 0.0.40
codegen_flags: <defaults>
</compile_context>

<pallas_src>
import functools

import jax
import jax.numpy as jnp
from jax import lax
from jax.experimental import pallas as pl
from jax.experimental.pallas import tpu as pltpu


# ----------------------------- Pallas kernel ------------------------------- #
def mstb_kernel(x_ref, w5_ref, w3_ref, wr_ref, wf_ref, b_ref, o_ref,
                *, T, C, dilation, btile):
    d = dilation
    BT = btile * T

    def tap(off):
        # Static-offset shifted window of the padded input tile; time stays on
        # sublanes, channels stay on lanes.
        return x_ref[:, off:off + T, :].reshape(BT, C)

    def acc_taps(offsets, w_ref):
        # Accumulate K=C matmuls over shifted views instead of materializing a
        # (BT, K*C) tap-concat (removes ~5x of the per-step VMEM working set
        # plus the unaligned-slice relayout copies).
        out = jnp.dot(tap(offsets[0]), w_ref[0],
                      preferred_element_type=jnp.float32)
        for j, off in enumerate(offsets[1:], start=1):
            out = out + jnp.dot(tap(off), w_ref[j],
                                preferred_element_type=jnp.float32)
        return out

    s2 = acc_taps([0, d, 2 * d, 3 * d, 4 * d], w5_ref)       # k=5 branch
    s1 = acc_taps([d, 2 * d, 3 * d], w3_ref)                 # k=3 branch
    r = acc_taps([2 * d - 1, 2 * d, 2 * d + 1], wr_ref)      # folded residual

    # conv bias + BN affine pre-folded on the host; one bias row per path.
    s1 = jnp.maximum(s1 + b_ref[0:1, :], 0.0)
    s2 = jnp.maximum(s2 + b_ref[1:2, :], 0.0)
    r = r + b_ref[2:3, :]

    # fusion 1x1 split per branch: f = s1 @ wf1 + s2 @ wf2  (no lane concat).
    f = jnp.dot(s1.astype(jnp.bfloat16), wf_ref[0],
                preferred_element_type=jnp.float32)
    f = f + jnp.dot(s2.astype(jnp.bfloat16), wf_ref[1],
                    preferred_element_type=jnp.float32)

    y = jnp.maximum(f + b_ref[3:4, :] + r, 0.0)
    # Lane-dense store in (batch, T, C); the NCT permute is done in the
    # wrapper instead of btile in-kernel transposes with T on lanes.
    o_ref[...] = y.reshape(btile, T, C).astype(o_ref.dtype)


# ------------------------------ JAX wrapper -------------------------------- #
def _vmem_capacity_bytes():
    try:
        info = pltpu.get_tpu_info()
        cap = getattr(info, "vmem_capacity_bytes", None)
        if cap:
            return int(cap)
    except Exception:
        pass
    return 64 << 20  # conservative fallback (v7x per-TensorCore VMEM)


def _per_step_vmem_bytes(bt, T, Tpad, C):
    x_tile = bt * Tpad * C * 2            # bf16 input tile
    out_tile = bt * T * C * 4             # f32 output tile
    weights = (5 + 3 + 3 + 2) * C * C * 2 + 4 * C * 4
    temps = 5 * bt * T * C * 4            # s1, s2, r, f + in-flight tap (f32)
    # BlockSpec double-buffers inputs/outputs (weights too, even though they
    # are grid-invariant; pipeline_mode=pl.Buffered(1) could reclaim the
    # second weight copy at very large C).
    return 2 * x_tile + 2 * out_tile + 2 * weights + temps


def _pick_batch_tile(N, per_step_fn, budget, min_steps):
    divisors = [d for d in range(1, N + 1) if N % d == 0]
    fitting = [d for d in divisors if per_step_fn(d) <= budget] or [1]
    with_steps = [d for d in fitting if N // d >= min_steps]
    return max(with_steps) if with_steps else max(fitting)


def multiscale_temporal_block(x_nct, p, dilation=1, eps=1e-5, batch_tile=None):
    N, C, T = x_nct.shape
    maxpad = 2 * dilation
    Tpad = T + 2 * maxpad

    cap = _vmem_capacity_bytes()
    # Generation-aware working-set budget: ~48 MiB on v7x (64 MiB VMEM),
    # ~96 MiB on v5e/v6e (128 MiB VMEM).
    budget = int(0.75 * cap)
    # v7x (2 TensorCores, 64 MiB VMEM): keep >= 4 grid steps so each core gets
    # >= 2 iterations to pipeline; single-TC chips keep the biggest tile.
    min_steps = 4 if cap <= (64 << 20) else 2

    per_step = lambda bt: _per_step_vmem_bytes(bt, T, Tpad, C)
    if batch_tile is None:
        batch_tile = _pick_batch_tile(N, per_step, budget, min_steps)
    assert N % batch_tile == 0

    # glue: NCT -> NTC, pad time axis with the max halo, bf16 matmul operands.
    x_ntc = jnp.transpose(x_nct, (0, 2, 1))
    x_pad = jnp.pad(x_ntc, ((0, 0), (maxpad, maxpad), (0, 0))).astype(jnp.bfloat16)

    # ---- fold conv bias + BN affine (and depthwise conv) into tap weights ----
    def bn_affine(g, b, m, v):
        scale = g / jnp.sqrt(v + eps)
        return scale, b - m * scale

    s1s, s1sh = bn_affine(p['bn1_gamma'], p['bn1_beta'], p['bn1_mean'], p['bn1_var'])
    s2s, s2sh = bn_affine(p['bn2_gamma'], p['bn2_beta'], p['bn2_mean'], p['bn2_var'])
    rs, rsh = bn_affine(p['bnr_gamma'], p['bnr_beta'], p['bnr_mean'], p['bnr_var'])

    # branch tap weights: (Cout, Cin, K) -> (K, Cin, Cout), BN scale on columns
    w3_all = jnp.transpose(p['w3'], (2, 1, 0)) * s1s[None, None, :]      # (3,C,C)
    w5_all = jnp.transpose(p['w5'], (2, 1, 0)) * s2s[None, None, :]      # (5,C,C)
    b1 = s1s * p['b3'] + s1sh
    b2 = s2s * p['b5'] + s2sh

    # residual: depthwise(3) folded into the 1x1 conv, BN folded on top.
    wresT = p['wres'][:, :, 0].T                                         # (Cin,Cout)
    wr_all = jnp.stack([p['wdw'][:, 0, j][:, None] * wresT for j in range(3)],
                       axis=0) * rs[None, None, :]                       # (3,C,C)
    br = rs * (p['bdw'] @ wresT + p['bres']) + rsh

    # fusion 1x1 split per branch (avoids the (BT, 2C) concat in-kernel).
    wfT = p['wf'][:, :, 0].T                                             # (2C,Cout)
    wf_all = jnp.stack([wfT[:C], wfT[C:]], axis=0)                       # (2,C,C)

    biases = jnp.stack([b1, b2, br, p['bf']], axis=0).astype(jnp.float32)  # (4,C)

    w5_all = w5_all.astype(jnp.bfloat16)
    w3_all = w3_all.astype(jnp.bfloat16)
    wr_all = wr_all.astype(jnp.bfloat16)
    wf_all = wf_all.astype(jnp.bfloat16)

    vmem_limit = int(min(max(2 * per_step(batch_tile), 16 << 20),
                         100 << 20, cap - (4 << 20)))

    def full(a):
        nd = a.ndim
        return pl.BlockSpec(a.shape, lambda b: (0,) * nd)

    # TODO(synk): for long T, tile the time axis with a 2*dilation halo
    # (overlapping windows / manual DMA) instead of loading all of Tpad per
    # grid step; unnecessary at these shapes.
    out_ntc = pl.pallas_call(
        functools.partial(mstb_kernel, T=T, C=C, dilation=dilation,
                          btile=batch_tile),
        out_shape=jax.ShapeDtypeStruct((N, T, C), jnp.float32),
        grid=(N // batch_tile,),
        in_specs=[pl.BlockSpec((batch_tile, Tpad, C), lambda b: (b, 0, 0)),
                  full(w5_all), full(w3_all), full(wr_all), full(wf_all),
                  full(biases)],
        out_specs=pl.BlockSpec((batch_tile, T, C), lambda b: (b, 0, 0)),
        compiler_params=pltpu.CompilerParams(
            dimension_semantics=("parallel",),
            vmem_limit_bytes=vmem_limit),
    )(x_pad, w5_all, w3_all, wr_all, wf_all, biases)

    # Cheap wrapper-side permute back to PyTorch's NCT layout; the kernel's
    # store stays lane-dense (C on lanes).  Output could be bf16 if the
    # consumer accepts it (halves writeback bytes).
    return jnp.transpose(out_ntc, (0, 2, 1))


# --------------------------- pure-JAX reference ----------------------------- #
def reference(x, p, dilation=1, eps=1e-5):
    def conv1d(x, w, b, pad, dil=1, groups=1):
        y = lax.conv_general_dilated(
            x, w, (1,), [(pad, pad)], rhs_dilation=(dil,),
            dimension_numbers=('NCH', 'OIH', 'NCH'), feature_group_count=groups)
        return y + b[None, :, None]

    def bn(x, g, b, m, v):
        return ((x - m[None, :, None]) * (g / jnp.sqrt(v + eps))[None, :, None]
                + b[None, :, None])

    C = x.shape[1]
    r = conv1d(x, p['wdw'], p['bdw'], 1, 1, groups=C)
    r = conv1d(r, p['wres'], p['bres'], 0, 1)
    r = bn(r, p['bnr_gamma'], p['bnr_beta'], p['bnr_mean'], p['bnr_var'])

    s1 = jax.nn.relu(bn(conv1d(x, p['w3'], p['b3'], dilation, dilation),
                        p['bn1_gamma'], p['bn1_beta'], p['bn1_mean'], p['bn1_var']))
    s2 = jax.nn.relu(bn(conv1d(x, p['w5'], p['b5'], 2 * dilation, dilation),
                        p['bn2_gamma'], p['bn2_beta'], p['bn2_mean'], p['bn2_var']))
    f = conv1d(jnp.concatenate([s1, s2], axis=1), p['wf'], p['bf'], 0)
    return jax.nn.relu(f + r)


# --------------------------------- main ------------------------------------ #
if __name__ == "__main__":
    N, C, T = 2, 8, 16

    key = jax.random.PRNGKey(0)
    ks = jax.random.split(key, 24)
    nrm = lambda k, s, sc=0.1: sc * jax.random.normal(k, s, jnp.float32)
    uni = lambda k, s: jax.random.uniform(k, s, jnp.float32, 0.5, 1.5)

    params = dict(
        w3=nrm(ks[0], (C, C, 3)), b3=nrm(ks[1], (C,)),
        bn1_gamma=1.0 + nrm(ks[2], (C,)), bn1_beta=nrm(ks[3], (C,)),
        bn1_mean=nrm(ks[4], (C,)), bn1_var=uni(ks[5], (C,)),
        w5=nrm(ks[6], (C, C, 5)), b5=nrm(ks[7], (C,)),
        bn2_gamma=1.0 + nrm(ks[8], (C,)), bn2_beta=nrm(ks[9], (C,)),
        bn2_mean=nrm(ks[10], (C,)), bn2_var=uni(ks[11], (C,)),
        wdw=nrm(ks[12], (C, 1, 3)), bdw=nrm(ks[13], (C,)),
        wres=nrm(ks[14], (C, C, 1)), bres=nrm(ks[15], (C,)),
        bnr_gamma=1.0 + nrm(ks[16], (C,)), bnr_beta=nrm(ks[17], (C,)),
        bnr_mean=nrm(ks[18], (C,)), bnr_var=uni(ks[19], (C,)),
        wf=nrm(ks[20], (C, 2 * C, 1)), bf=nrm(ks[21], (C,)),
    )

    x = jax.random.normal(ks[22], (N, C, T), jnp.float32)

    # dilation = 1 (shared residual / k=3 taps) and dilation = 2 (distinct taps)
    for dil in (1, 2):
        out = jax.block_until_ready(
            multiscale_temporal_block(x, params, dilation=dil))
        ref = reference(x, params, dilation=dil)
        assert out.shape == (N, C, T)
        # bf16 matmul operands with f32 accumulation -> relaxed tolerance.
        assert jnp.allclose(out, ref, atol=2e-2, rtol=2e-2), \
            f"dilation={dil}: max abs err {jnp.max(jnp.abs(out - ref))}"

    print("KERNEL_OK")
</pallas_src>

<mosaic_0001>
module attributes {stable_mosaic.version = 11 : i64} {
  func.func @mstb_kernel(%arg0: i32, %arg1: memref<2x20x8xbf16, #tpu.memory_space<vmem>>, %arg2: memref<5x8x8xbf16, #tpu.memory_space<vmem>>, %arg3: memref<3x8x8xbf16, #tpu.memory_space<vmem>>, %arg4: memref<3x8x8xbf16, #tpu.memory_space<vmem>>, %arg5: memref<2x8x8xbf16, #tpu.memory_space<vmem>>, %arg6: memref<4x8xf32, #tpu.memory_space<vmem>>, %arg7: memref<2x16x8xf32, #tpu.memory_space<vmem>>) attributes {dimension_semantics = [#tpu.dimension_semantics<parallel>], iteration_bounds = array<i64: 1>, scalar_prefetch = 0 : i64, scratch_operands = 0 : i64, tpu.core_type = #tpu.core_type<tc>, window_params = [{transform_indices = @transform_0, window_bounds = array<i64: 2, 20, 8>}, {pipeline_mode = #tpu.pipeline_mode<synchronous>, transform_indices = @transform_1, window_bounds = array<i64: 5, 8, 8>}, {pipeline_mode = #tpu.pipeline_mode<synchronous>, transform_indices = @transform_2, window_bounds = array<i64: 3, 8, 8>}, {pipeline_mode = #tpu.pipeline_mode<synchronous>, transform_indices = @transform_3, window_bounds = array<i64: 3, 8, 8>}, {pipeline_mode = #tpu.pipeline_mode<synchronous>, transform_indices = @transform_4, window_bounds = array<i64: 2, 8, 8>}, {pipeline_mode = #tpu.pipeline_mode<synchronous>, transform_indices = @transform_5, window_bounds = array<i64: 4, 8>}, {transform_indices = @transform_6, window_bounds = array<i64: 2, 16, 8>}]} {
    %c0 = arith.constant 0 : index
    %c0_0 = arith.constant 0 : index
    %c0_1 = arith.constant 0 : index
    %0 = vector.load %arg1[%c0, %c0_0, %c0_1] : memref<2x20x8xbf16, #tpu.memory_space<vmem>>, vector<2x16x8xbf16>
    %1 = vector.shape_cast %0 : vector<2x16x8xbf16> to vector<32x8xbf16>
    %c0_2 = arith.constant 0 : index
    %c0_3 = arith.constant 0 : index
    %c0_4 = arith.constant 0 : index
    %2 = vector.load %arg2[%c0_2, %c0_3, %c0_4] : memref<5x8x8xbf16, #tpu.memory_space<vmem>>, vector<1x8x8xbf16>
    %3 = vector.shape_cast %2 : vector<1x8x8xbf16> to vector<8x8xbf16>
    %cst = arith.constant dense<0.000000e+00> : vector<32x8xf32>
    %4 = tpu.matmul %1, %3, %cst {dimension_numbers = #tpu.dot_dimension_numbers<[1], [0], [0], [1], [0, 0, 1, 1], [], []>} : vector<32x8xbf16>, vector<8x8xbf16>, vector<32x8xf32> -> vector<32x8xf32>
    %c0_5 = arith.constant 0 : index
    %c1 = arith.constant 1 : index
    %c0_6 = arith.constant 0 : index
    %5 = vector.load %arg1[%c0_5, %c1, %c0_6] : memref<2x20x8xbf16, #tpu.memory_space<vmem>>, vector<2x16x8xbf16>
    %6 = vector.shape_cast %5 : vector<2x16x8xbf16> to vector<32x8xbf16>
    %c1_7 = arith.constant 1 : index
    %c0_8 = arith.constant 0 : index
    %c0_9 = arith.constant 0 : index
    %7 = vector.load %arg2[%c1_7, %c0_8, %c0_9] : memref<5x8x8xbf16, #tpu.memory_space<vmem>>, vector<1x8x8xbf16>
    %8 = vector.shape_cast %7 : vector<1x8x8xbf16> to vector<8x8xbf16>
    %cst_10 = arith.constant dense<0.000000e+00> : vector<32x8xf32>
    %9 = tpu.matmul %6, %8, %cst_10 {dimension_numbers = #tpu.dot_dimension_numbers<[1], [0], [0], [1], [0, 0, 1, 1], [], []>} : vector<32x8xbf16>, vector<8x8xbf16>, vector<32x8xf32> -> vector<32x8xf32>
    %10 = arith.addf %4, %9 : vector<32x8xf32>
    %c0_11 = arith.constant 0 : index
    %c2 = arith.constant 2 : index
    %c0_12 = arith.constant 0 : index
    %11 = vector.load %arg1[%c0_11, %c2, %c0_12] : memref<2x20x8xbf16, #tpu.memory_space<vmem>>, vector<2x16x8xbf16>
    %12 = vector.shape_cast %11 : vector<2x16x8xbf16> to vector<32x8xbf16>
    %c2_13 = arith.constant 2 : index
    %c0_14 = arith.constant 0 : index
    %c0_15 = arith.constant 0 : index
    %13 = vector.load %arg2[%c2_13, %c0_14, %c0_15] : memref<5x8x8xbf16, #tpu.memory_space<vmem>>, vector<1x8x8xbf16>
    %14 = vector.shape_cast %13 : vector<1x8x8xbf16> to vector<8x8xbf16>
    %cst_16 = arith.constant dense<0.000000e+00> : vector<32x8xf32>
    %15 = tpu.matmul %12, %14, %cst_16 {dimension_numbers = #tpu.dot_dimension_numbers<[1], [0], [0], [1], [0, 0, 1, 1], [], []>} : vector<32x8xbf16>, vector<8x8xbf16>, vector<32x8xf32> -> vector<32x8xf32>
    %16 = arith.addf %10, %15 : vector<32x8xf32>
    %c0_17 = arith.constant 0 : index
    %c3 = arith.constant 3 : index
    %c0_18 = arith.constant 0 : index
    %17 = vector.load %arg1[%c0_17, %c3, %c0_18] : memref<2x20x8xbf16, #tpu.memory_space<vmem>>, vector<2x16x8xbf16>
    %18 = vector.shape_cast %17 : vector<2x16x8xbf16> to vector<32x8xbf16>
    %c3_19 = arith.constant 3 : index
    %c0_20 = arith.constant 0 : index
    %c0_21 = arith.constant 0 : index
    %19 = vector.load %arg2[%c3_19, %c0_20, %c0_21] : memref<5x8x8xbf16, #tpu.memory_space<vmem>>, vector<1x8x8xbf16>
    %20 = vector.shape_cast %19 : vector<1x8x8xbf16> to vector<8x8xbf16>
    %cst_22 = arith.constant dense<0.000000e+00> : vector<32x8xf32>
    %21 = tpu.matmul %18, %20, %cst_22 {dimension_numbers = #tpu.dot_dimension_numbers<[1], [0], [0], [1], [0, 0, 1, 1], [], []>} : vector<32x8xbf16>, vector<8x8xbf16>, vector<32x8xf32> -> vector<32x8xf32>
    %22 = arith.addf %16, %21 : vector<32x8xf32>
    %c0_23 = arith.constant 0 : index
    %c4 = arith.constant 4 : index
    %c0_24 = arith.constant 0 : index
    %23 = vector.load %arg1[%c0_23, %c4, %c0_24] : memref<2x20x8xbf16, #tpu.memory_space<vmem>>, vector<2x16x8xbf16>
    %24 = vector.shape_cast %23 : vector<2x16x8xbf16> to vector<32x8xbf16>
    %c4_25 = arith.constant 4 : index
    %c0_26 = arith.constant 0 : index
    %c0_27 = arith.constant 0 : index
    %25 = vector.load %arg2[%c4_25, %c0_26, %c0_27] : memref<5x8x8xbf16, #tpu.memory_space<vmem>>, vector<1x8x8xbf16>
    %26 = vector.shape_cast %25 : vector<1x8x8xbf16> to vector<8x8xbf16>
    %cst_28 = arith.constant dense<0.000000e+00> : vector<32x8xf32>
    %27 = tpu.matmul %24, %26, %cst_28 {dimension_numbers = #tpu.dot_dimension_numbers<[1], [0], [0], [1], [0, 0, 1, 1], [], []>} : vector<32x8xbf16>, vector<8x8xbf16>, vector<32x8xf32> -> vector<32x8xf32>
    %28 = arith.addf %22, %27 : vector<32x8xf32>
    %c0_29 = arith.constant 0 : index
    %c1_30 = arith.constant 1 : index
    %c0_31 = arith.constant 0 : index
    %29 = vector.load %arg1[%c0_29, %c1_30, %c0_31] : memref<2x20x8xbf16, #tpu.memory_space<vmem>>, vector<2x16x8xbf16>
    %30 = vector.shape_cast %29 : vector<2x16x8xbf16> to vector<32x8xbf16>
    %c0_32 = arith.constant 0 : index
    %c0_33 = arith.constant 0 : index
    %c0_34 = arith.constant 0 : index
    %31 = vector.load %arg3[%c0_32, %c0_33, %c0_34] : memref<3x8x8xbf16, #tpu.memory_space<vmem>>, vector<1x8x8xbf16>
    %32 = vector.shape_cast %31 : vector<1x8x8xbf16> to vector<8x8xbf16>
    %cst_35 = arith.constant dense<0.000000e+00> : vector<32x8xf32>
    %33 = tpu.matmul %30, %32, %cst_35 {dimension_numbers = #tpu.dot_dimension_numbers<[1], [0], [0], [1], [0, 0, 1, 1], [], []>} : vector<32x8xbf16>, vector<8x8xbf16>, vector<32x8xf32> -> vector<32x8xf32>
    %c0_36 = arith.constant 0 : index
    %c2_37 = arith.constant 2 : index
    %c0_38 = arith.constant 0 : index
    %34 = vector.load %arg1[%c0_36, %c2_37, %c0_38] : memref<2x20x8xbf16, #tpu.memory_space<vmem>>, vector<2x16x8xbf16>
    %35 = vector.shape_cast %34 : vector<2x16x8xbf16> to vector<32x8xbf16>
    %c1_39 = arith.constant 1 : index
    %c0_40 = arith.constant 0 : index
    %c0_41 = arith.constant 0 : index
    %36 = vector.load %arg3[%c1_39, %c0_40, %c0_41] : memref<3x8x8xbf16, #tpu.memory_space<vmem>>, vector<1x8x8xbf16>
    %37 = vector.shape_cast %36 : vector<1x8x8xbf16> to vector<8x8xbf16>
    %cst_42 = arith.constant dense<0.000000e+00> : vector<32x8xf32>
    %38 = tpu.matmul %35, %37, %cst_42 {dimension_numbers = #tpu.dot_dimension_numbers<[1], [0], [0], [1], [0, 0, 1, 1], [], []>} : vector<32x8xbf16>, vector<8x8xbf16>, vector<32x8xf32> -> vector<32x8xf32>
    %39 = arith.addf %33, %38 : vector<32x8xf32>
    %c0_43 = arith.constant 0 : index
    %c3_44 = arith.constant 3 : index
    %c0_45 = arith.constant 0 : index
    %40 = vector.load %arg1[%c0_43, %c3_44, %c0_45] : memref<2x20x8xbf16, #tpu.memory_space<vmem>>, vector<2x16x8xbf16>
    %41 = vector.shape_cast %40 : vector<2x16x8xbf16> to vector<32x8xbf16>
    %c2_46 = arith.constant 2 : index
    %c0_47 = arith.constant 0 : index
    %c0_48 = arith.constant 0 : index
    %42 = vector.load %arg3[%c2_46, %c0_47, %c0_48] : memref<3x8x8xbf16, #tpu.memory_space<vmem>>, vector<1x8x8xbf16>
    %43 = vector.shape_cast %42 : vector<1x8x8xbf16> to vector<8x8xbf16>
    %cst_49 = arith.constant dense<0.000000e+00> : vector<32x8xf32>
    %44 = tpu.matmul %41, %43, %cst_49 {dimension_numbers = #tpu.dot_dimension_numbers<[1], [0], [0], [1], [0, 0, 1, 1], [], []>} : vector<32x8xbf16>, vector<8x8xbf16>, vector<32x8xf32> -> vector<32x8xf32>
    %45 = arith.addf %39, %44 : vector<32x8xf32>
    %c0_50 = arith.constant 0 : index
    %c1_51 = arith.constant 1 : index
    %c0_52 = arith.constant 0 : index
    %46 = vector.load %arg1[%c0_50, %c1_51, %c0_52] : memref<2x20x8xbf16, #tpu.memory_space<vmem>>, vector<2x16x8xbf16>
    %47 = vector.shape_cast %46 : vector<2x16x8xbf16> to vector<32x8xbf16>
    %c0_53 = arith.constant 0 : index
    %c0_54 = arith.constant 0 : index
    %c0_55 = arith.constant 0 : index
    %48 = vector.load %arg4[%c0_53, %c0_54, %c0_55] : memref<3x8x8xbf16, #tpu.memory_space<vmem>>, vector<1x8x8xbf16>
    %49 = vector.shape_cast %48 : vector<1x8x8xbf16> to vector<8x8xbf16>
    %cst_56 = arith.constant dense<0.000000e+00> : vector<32x8xf32>
    %50 = tpu.matmul %47, %49, %cst_56 {dimension_numbers = #tpu.dot_dimension_numbers<[1], [0], [0], [1], [0, 0, 1, 1], [], []>} : vector<32x8xbf16>, vector<8x8xbf16>, vector<32x8xf32> -> vector<32x8xf32>
    %c0_57 = arith.constant 0 : index
    %c2_58 = arith.constant 2 : index
    %c0_59 = arith.constant 0 : index
    %51 = vector.load %arg1[%c0_57, %c2_58, %c0_59] : memref<2x20x8xbf16, #tpu.memory_space<vmem>>, vector<2x16x8xbf16>
    %52 = vector.shape_cast %51 : vector<2x16x8xbf16> to vector<32x8xbf16>
    %c1_60 = arith.constant 1 : index
    %c0_61 = arith.constant 0 : index
    %c0_62 = arith.constant 0 : index
    %53 = vector.load %arg4[%c1_60, %c0_61, %c0_62] : memref<3x8x8xbf16, #tpu.memory_space<vmem>>, vector<1x8x8xbf16>
    %54 = vector.shape_cast %53 : vector<1x8x8xbf16> to vector<8x8xbf16>
    %cst_63 = arith.constant dense<0.000000e+00> : vector<32x8xf32>
    %55 = tpu.matmul %52, %54, %cst_63 {dimension_numbers = #tpu.dot_dimension_numbers<[1], [0], [0], [1], [0, 0, 1, 1], [], []>} : vector<32x8xbf16>, vector<8x8xbf16>, vector<32x8xf32> -> vector<32x8xf32>
    %56 = arith.addf %50, %55 : vector<32x8xf32>
    %c0_64 = arith.constant 0 : index
    %c3_65 = arith.constant 3 : index
    %c0_66 = arith.constant 0 : index
    %57 = vector.load %arg1[%c0_64, %c3_65, %c0_66] : memref<2x20x8xbf16, #tpu.memory_space<vmem>>, vector<2x16x8xbf16>
    %58 = vector.shape_cast %57 : vector<2x16x8xbf16> to vector<32x8xbf16>
    %c2_67 = arith.constant 2 : index
    %c0_68 = arith.constant 0 : index
    %c0_69 = arith.constant 0 : index
    %59 = vector.load %arg4[%c2_67, %c0_68, %c0_69] : memref<3x8x8xbf16, #tpu.memory_space<vmem>>, vector<1x8x8xbf16>
    %60 = vector.shape_cast %59 : vector<1x8x8xbf16> to vector<8x8xbf16>
    %cst_70 = arith.constant dense<0.000000e+00> : vector<32x8xf32>
    %61 = tpu.matmul %58, %60, %cst_70 {dimension_numbers = #tpu.dot_dimension_numbers<[1], [0], [0], [1], [0, 0, 1, 1], [], []>} : vector<32x8xbf16>, vector<8x8xbf16>, vector<32x8xf32> -> vector<32x8xf32>
    %62 = arith.addf %56, %61 : vector<32x8xf32>
    %c0_71 = arith.constant 0 : index
    %c0_72 = arith.constant 0 : index
    %63 = vector.load %arg6[%c0_71, %c0_72] : memref<4x8xf32, #tpu.memory_space<vmem>>, vector<1x8xf32>
    %64 = vector.broadcast %63 : vector<1x8xf32> to vector<32x8xf32>
    %65 = arith.addf %45, %64 : vector<32x8xf32>
    %cst_73 = arith.constant 0.000000e+00 : f32
    %66 = vector.broadcast %cst_73 : f32 to vector<32x8xf32>
    %67 = arith.maximumf %65, %66 : vector<32x8xf32>
    %c1_74 = arith.constant 1 : index
    %c0_75 = arith.constant 0 : index
    %68 = vector.load %arg6[%c1_74, %c0_75] : memref<4x8xf32, #tpu.memory_space<vmem>>, vector<1x8xf32>
    %69 = vector.broadcast %68 : vector<1x8xf32> to vector<32x8xf32>
    %70 = arith.addf %28, %69 : vector<32x8xf32>
    %cst_76 = arith.constant 0.000000e+00 : f32
    %71 = vector.broadcast %cst_76 : f32 to vector<32x8xf32>
    %72 = arith.maximumf %70, %71 : vector<32x8xf32>
    %c2_77 = arith.constant 2 : index
    %c0_78 = arith.constant 0 : index
    %73 = vector.load %arg6[%c2_77, %c0_78] : memref<4x8xf32, #tpu.memory_space<vmem>>, vector<1x8xf32>
    %74 = vector.broadcast %73 : vector<1x8xf32> to vector<32x8xf32>
    %75 = arith.addf %62, %74 : vector<32x8xf32>
    %76 = arith.truncf %67 : vector<32x8xf32> to vector<32x8xbf16>
    %c0_79 = arith.constant 0 : index
    %c0_80 = arith.constant 0 : index
    %c0_81 = arith.constant 0 : index
    %77 = vector.load %arg5[%c0_79, %c0_80, %c0_81] : memref<2x8x8xbf16, #tpu.memory_space<vmem>>, vector<1x8x8xbf16>
    %78 = vector.shape_cast %77 : vector<1x8x8xbf16> to vector<8x8xbf16>
    %cst_82 = arith.constant dense<0.000000e+00> : vector<32x8xf32>
    %79 = tpu.matmul %76, %78, %cst_82 {dimension_numbers = #tpu.dot_dimension_numbers<[1], [0], [0], [1], [0, 0, 1, 1], [], []>} : vector<32x8xbf16>, vector<8x8xbf16>, vector<32x8xf32> -> vector<32x8xf32>
    %80 = arith.truncf %72 : vector<32x8xf32> to vector<32x8xbf16>
    %c1_83 = arith.constant 1 : index
    %c0_84 = arith.constant 0 : index
    %c0_85 = arith.constant 0 : index
    %81 = vector.load %arg5[%c1_83, %c0_84, %c0_85] : memref<2x8x8xbf16, #tpu.memory_space<vmem>>, vector<1x8x8xbf16>
    %82 = vector.shape_cast %81 : vector<1x8x8xbf16> to vector<8x8xbf16>
    %cst_86 = arith.constant dense<0.000000e+00> : vector<32x8xf32>
    %83 = tpu.matmul %80, %82, %cst_86 {dimension_numbers = #tpu.dot_dimension_numbers<[1], [0], [0], [1], [0, 0, 1, 1], [], []>} : vector<32x8xbf16>, vector<8x8xbf16>, vector<32x8xf32> -> vector<32x8xf32>
    %84 = arith.addf %79, %83 : vector<32x8xf32>
    %c3_87 = arith.constant 3 : index
    %c0_88 = arith.constant 0 : index
    %85 = vector.load %arg6[%c3_87, %c0_88] : memref<4x8xf32, #tpu.memory_space<vmem>>, vector<1x8xf32>
    %86 = vector.broadcast %85 : vector<1x8xf32> to vector<32x8xf32>
    %87 = arith.addf %84, %86 : vector<32x8xf32>
    %88 = arith.addf %87, %75 : vector<32x8xf32>
    %cst_89 = arith.constant 0.000000e+00 : f32
    %89 = vector.broadcast %cst_89 : f32 to vector<32x8xf32>
    %90 = arith.maximumf %88, %89 : vector<32x8xf32>
    %91 = vector.shape_cast %90 : vector<32x8xf32> to vector<2x16x8xf32>
    %c0_90 = arith.constant 0 : index
    %c0_91 = arith.constant 0 : index
    %c0_92 = arith.constant 0 : index
    %92 = vector.load %arg7[%c0_90, %c0_91, %c0_92] : memref<2x16x8xf32, #tpu.memory_space<vmem>>, vector<2x16x8xf32>
    tpu.vector_store %arg7[%c0_90, %c0_91, %c0_92], %91 {strides = array<i32>} : memref<2x16x8xf32, #tpu.memory_space<vmem>>, vector<2x16x8xf32>,
    return
  }
  func.func @transform_0(%arg0: i32) -> (i32, i32, i32) {
    %c0_i32 = arith.constant 0 : i32
    %c0_i32_0 = arith.constant 0 : i32
    %c0_i32_1 = arith.constant 0 : i32
    return %arg0, %c0_i32, %c0_i32_0 : i32, i32, i32
  }
  func.func @transform_1(%arg0: i32) -> (i32, i32, i32) {
    %c0_i32 = arith.constant 0 : i32
    %c0_i32_0 = arith.constant 0 : i32
    %c0_i32_1 = arith.constant 0 : i32
    %c0_i32_2 = arith.constant 0 : i32
    return %c0_i32, %c0_i32_0, %c0_i32_1 : i32, i32, i32
  }
  func.func @transform_2(%arg0: i32) -> (i32, i32, i32) {
    %c0_i32 = arith.constant 0 : i32
    %c0_i32_0 = arith.constant 0 : i32
    %c0_i32_1 = arith.constant 0 : i32
    %c0_i32_2 = arith.constant 0 : i32
    return %c0_i32, %c0_i32_0, %c0_i32_1 : i32, i32, i32
  }
  func.func @transform_3(%arg0: i32) -> (i32, i32, i32) {
    %c0_i32 = arith.constant 0 : i32
    %c0_i32_0 = arith.constant 0 : i32
    %c0_i32_1 = arith.constant 0 : i32
    %c0_i32_2 = arith.constant 0 : i32
    return %c0_i32, %c0_i32_0, %c0_i32_1 : i32, i32, i32
  }
  func.func @transform_4(%arg0: i32) -> (i32, i32, i32) {
    %c0_i32 = arith.constant 0 : i32
    %c0_i32_0 = arith.constant 0 : i32
    %c0_i32_1 = arith.constant 0 : i32
    %c0_i32_2 = arith.constant 0 : i32
    return %c0_i32, %c0_i32_0, %c0_i32_1 : i32, i32, i32
  }
  func.func @transform_5(%arg0: i32) -> (i32, i32) {
    %c0_i32 = arith.constant 0 : i32
    %c0_i32_0 = arith.constant 0 : i32
    %c0_i32_1 = arith.constant 0 : i32
    return %c0_i32, %c0_i32_0 : i32, i32
  }
  func.func @transform_6(%arg0: i32) -> (i32, i32, i32) {
    %c0_i32 = arith.constant 0 : i32
    %c0_i32_0 = arith.constant 0 : i32
    %c0_i32_1 = arith.constant 0 : i32
    return %arg0, %c0_i32, %c0_i32_0 : i32, i32, i32
  }
}

</mosaic_0001>

<bundles_post_ra>
// kernel: tpu_custom_call.1
= control target key start
LH: loop header
LB: loop body
LE: loop exit
PB: predicated region body
PF: predicated region fallthrough
CT: control target
= control target key end

     0   :  { %11 = vsyncpa [#allocation3], 0  ;;  %s1598_s0 = inlined_call_operand.vmem [shape: bf16[2,20,8], index: 0, kind: input, shape index: {}]   ;;  %s1599_s1 = inlined_call_operand.vmem [shape: bf16[5,8,8], index: 1, kind: input, shape index: {}]   ;;  %s1600_s2 = inlined_call_operand.vmem [shape: bf16[3,8,8], index: 2, kind: input, shape index: {}]   ;;  %s1601_s3 = inlined_call_operand.hbm [shape: bf16[3,8,8], index: 3, kind: input, shape index: {}]   ;;  %s1602_s4 = inlined_call_operand.hbm [shape: bf16[2,8,8], index: 4, kind: input, shape index: {}]   ;;  %s1603_s5 = inlined_call_operand.vmem [shape: f32[4,8], index: 5, kind: input, shape index: {}]   ;;  %s1604_s6 = inlined_call_operand.vmem [shape: f32[2,16,8], index: 6, kind: output, shape index: {}]  }
   0x1   :  { %12 = vsyncpa [#allocation5], 0  ;;  %s1298_s21 = smov [#allocation2]  }
   0x2   :  { %s24_s22 = sshll.u32 %s1298_s21, 4  ;;  %s25_s22 = int_to_ptr.vmem [resolvable:$true] %s24_s22 }
   0x3   :  { %s1262_s23 = scalar_lea.vmem %s25_s22, 192  ;;  %p1267_p1 = scmp.lt.s32.totalorder %s25_s22, %s25_s22 }
   0x4   :  { %p1263_p0 = scmp.ne.s32.totalorder %s25_s22, %s1262_s23  ;;  %p1268_p2 = scmp.lt.s32.totalorder %s1262_s23, %s1262_s23 }
   0x6   :  { %p1269_p3 = por %p1268_p2, %p1267_p1 }
   0x8   :  { %p1270_p4 = pnand %p1269_p3, %p1263_p0 }
   0xa   :  { %1273 = shalt.err (!%p1270_p4)
}
   0xb   :  { %s1299_s24 = smov 64   ;;  %s1300_s25 = smov 4  }
   0xc   :  { %30 = dma.hbm_to_vmem [thread:$0]  %s1601_s3, 192, %s25_s22, [#allocation3], %s1299_s24, %s1299_s24, %s1300_s25  }
   0xd   :  { %s1301_s28 = smov [#allocation4]  }
   0xe   :  { %s36_s29 = sshll.u32 %s1301_s28, 4  ;;  %s37_s29 = int_to_ptr.vmem [resolvable:$true] %s36_s29 }
   0xf   :  { %s1282_s30 = scalar_lea.vmem %s37_s29, 128  ;;  %p1287_p6 = scmp.lt.s32.totalorder %s37_s29, %s37_s29 }
  0x10   :  { %p1283_p5 = scmp.ne.s32.totalorder %s37_s29, %s1282_s30  ;;  %p1288_p7 = scmp.lt.s32.totalorder %s1282_s30, %s1282_s30 }
  0x12   :  { %p1289_p8 = por %p1288_p7, %p1287_p6 }
  0x14   :  { %p1290_p9 = pnand %p1289_p8, %p1283_p5 }
  0x16   :  { %1293 = shalt.err (!%p1290_p9)
}
  0x17   :  { %42 = dma.hbm_to_vmem [thread:$0]  %s1602_s4, 128, %s37_s29, [#allocation5], %s1299_s24, %s1299_s24, %s1300_s25  }
  0x18   :  { %1294 = dma.done.wait [#allocation3], 192  }
  0x19   :  { %1295 = vsyncadd [#allocation3], 4294967104 }
  0x1a   :  { %1296 = dma.done.wait [#allocation5], 128  }
  0x1b   :  { %1297 = vsyncadd [#allocation5], 4294967168  ;;  %vm125_vm0 = vcmask 1043456   ;;  %vm118_vm1 = vcmask 64512   ;;  %vm59_vm2 = vsmask.f32 3328 }
  0x1c   :  { %vm60_vm3 = vsmask.f32 7440  ;;  %v56_v0 = vld [vmem:[%s1599_s1] sm:$0xf]  ;;  %v1068_v1 = vld [vmem:[%s1599_s1 + $0x4] sm:$0xf] }
  0x1d   :  { %v52_v2 = vld [vmem:[%s1598_s0] sm:$0xf]  ;;  %1236 = vmatprep.subr.msk.bf16.mxu1 %vm125_vm0, %v56_v0  ;;  %v195_v3 = vsel %vm125_vm0, %v56_v0, 0  ;;  %1235 = vmatprep.subr.msk.bf16.mxu0 %vm125_vm0, %v1068_v1  ;;  %v1358_v4 = vld [vmem:[%s1598_s0 + $0x4] sm:$0xf]  ;;  %v127_v7 = vsel %vm125_vm0, %v1068_v1, 0  ;;  %vm1395_vm6 = vmor %vm59_vm2, %vm60_vm3 }
  0x1e   :  { %v63_v5 = vshrl.u32 %v52_v2, 16  ;;  %v66_v6 = vshll.u32 %v52_v2, 16  ;;  %1164 = vmatpush3.bf16.msra.mxu1 %v195_v3  ;;  %v1073_v8 = vcombine.low %v52_v2, %v1358_v4  ;;  %1158 = vmatpush3.bf16.msra.mxu0 %v127_v7  ;;  %v54_v9 = vld [vmem:[%s1598_s0 + $0xc] sm:$0xf]  ;;  %v1368_v10 = vld [vmem:[%s1598_s0 + $0x10] sm:$0xf] }
  0x1f   :  { %v1373_v11 = vld [vmem:[%s1598_s0 + $0x8] sm:$0x1]  ;;  %v87_v14 = vshrl.u32 %v54_v9, 16  ;;  %v90_v15 = vshll.u32 %v54_v9, 16  ;;  %v1074_v17 = vcombine.low %v54_v9, %v1368_v10  ;;  %v72_v18 = vshll.u32 %v1358_v4, 16 }
  0x20   :  { %v65_v12 = vrot.slane %v63_v5, 4  ;;  %v68_v13 = vrot.slane %v66_v6, 5  ;;  %v1079_v16 = vld [vmem:[%s1599_s1 + $0x8] sm:$0xf]  ;;  %1165 = vmatprep.mubr.msk.bf16.mxu1 %vm118_vm1, %v1073_v8  ;;  %v76_v19 = vshrl.u32 %v1358_v4, 16  ;;  %v82_v20 = vshll.u32 %v1373_v11, 16 }
  0x21   :  { %1237 = vmatprep.subr.msk.bf16.mxu0 %vm125_vm0, %v1079_v16  ;;  %vm341_vm4 = vsmask.f32 2304  ;;  %vm342_vm5 = vsmask.f32 6416  ;;  %v89_v22 = vrot.slane %v87_v14, 4  ;;  %v92_v23 = vrot.slane %v90_v15, 5  ;;  %1166 = vmatmul.mubr.msk.bf16.vlgmr.msra.gmra.mxu1 %vm118_vm1, %v1074_v17 }
  0x22   :  { %v69_v21 = vor.u32 %v68_v13, %v65_v12  ;;  %v1387_v24 = vld [vmem:[%s1598_s0 + $0x14] sm:$0x1]  ;;  %v1084_v25 = vld [vmem:[%s1599_s1 + $0xc] sm:$0xf]  ;;  %v74_v27 = vrot.slane %v72_v18, 5  ;;  %v78_v28 = vrot.slane %v76_v19, 4  ;;  %vm1449_vm11 = vmor %vm341_vm4, %vm342_vm5 }
  0x23   :  { %v84_v29 = vrot.slane %v82_v20, 5  ;;  %v260_v30 = vrot.slane %v1373_v11, 5  ;;  %1238 = vmatprep.subr.msk.bf16.mxu1 %vm125_vm0, %v1084_v25  ;;  %vm252_vm7 = vcmask 1042432   ;;  %vm253_vm8 = vcmask 1046532   ;;  %v1408_v39 = vld [vmem:[%s1598_s0] sm:$0xe] }
  0x24   :  { %v70_v31 = vrot.slane %v69_v21, 4  ;;  %v93_v32 = vor.u32 %v92_v23, %v89_v22  ;;  %v96_v33 = vshll.u32 %v1368_v10, 16  ;;  %v100_v34 = vshrl.u32 %v1368_v10, 16  ;;  %v1415_v44 = vld [vmem:[%s1598_s0 + $0x8] sm:$0x3]  ;;  %vm1459_vm12 = vmor %vm252_vm7, %vm253_vm8 }
  0x25   :  { %v79_v35 = vor.u32 %v78_v28, %v74_v27  ;;  %v354_v36 = vrot.slane %v72_v18, 6  ;;  %v106_v37 = vshll.u32 %v1387_v24, 16  ;;  %v284_v38 = vsel %vm125_vm0, %v1079_v16, 0  ;;  %v1425_v53 = vld [vmem:[%s1598_s0 + $0xc] sm:$0xe] }
  0x26   :  { %v75_v40 = vsel %vm1395_vm6, %v70_v31, %v74_v27  ;;  %v94_v41 = vrot.slane %v93_v32, 4  ;;  %v98_v42 = vrot.slane %v96_v33, 5  ;;  %v102_v43 = vrot.slane %v100_v34, 4  ;;  %v1096_v54 = vld [vmem:[%s1600_s2 + $0x4] sm:$0xf] }
  0x27   :  { %v80_v45 = vrot.slane %v79_v35, 4  ;;  %v108_v46 = vrot.slane %v106_v37, 5  ;;  %v377_v47 = vrot.slane %v96_v33, 6  ;;  %v405_v48 = vsel %vm125_vm0, %v1084_v25, 0  ;;  %v1440_v2 = vld [vmem:[%s1598_s0 + $0x14] sm:$0x3] }
  0x28   :  { %v99_v49 = vsel %vm1395_vm6, %v94_v41, %v98_v42  ;;  %v103_v50 = vor.u32 %v102_v43, %v98_v42  ;;  %1176 = vmatpush3.bf16.msra.mxu1 %v405_v48  ;;  %v345_v51 = vshrl.u32 %v1408_v39, 16  ;;  %v348_v52 = vshll.u32 %v1408_v39, 16  ;;  %v1091_v21 = vld [vmem:[%s1599_s1 + $0x10] sm:$0xf]  ;;  %v460_v32 = vld [vmem:[%s1598_s0] sm:$0xc] }
  0x29   :  { %v85_v55 = vsel %vm1395_vm6, %v80_v45, %v84_v29  ;;  %v353_v56 = vrot.slane %v76_v19, 5  ;;  %v359_v57 = vshrl.u32 %v1415_v44, 16  ;;  %v362_v58 = vshll.u32 %v1415_v44, 16  ;;  %1240 = vmatprep.subr.msk.bf16.mxu1 %vm125_vm0, %v1096_v54  ;;  %v461_v41 = vld [vmem:[%s1598_s0 + $0xc] sm:$0xc] }
  0x2a   :  { %vm466_vm9 = vcmask 1041408   ;;  %vm467_vm10 = vcmask 1045508   ;;  %v1435_v59 = vcombine.low %v75_v40, %v85_v55  ;;  %v104_v60 = vrot.slane %v103_v50, 4  ;;  %v720_v6 = vld [vmem:[#allocation2 + $0x4] sm:$0xf] }
  0x2b   :  { %v347_v61 = vrot.slane %v345_v51, 5  ;;  %v350_v62 = vrot.slane %v348_v52, 6  ;;  %v355_v63 = vor.u32 %v354_v36, %v353_v56  ;;  %v361_v0 = vrot.slane %v359_v57, 5  ;;  %vm1502_vm13 = vmor %vm466_vm9, %vm467_vm10 }
  0x2c   :  { %v364_v1 = vrot.slane %v362_v58, 6  ;;  %v368_v3 = vshrl.u32 %v1425_v53, 16  ;;  %1159 = vmatprep.mubr.msk.bf16.mxu0 %vm118_vm1, %v1435_v59  ;;  %v109_v5 = vsel %vm1395_vm6, %v104_v60, %v108_v46  ;;  %v371_v8 = vshll.u32 %v1425_v53, 16 }
  0x2d   :  { %v351_v7 = vor.u32 %v350_v62, %v347_v61  ;;  %v376_v9 = vrot.slane %v100_v34, 5  ;;  %v1454_v12 = vcombine.low %v99_v49, %v109_v5  ;;  %v357_v13 = vrot.slane %v355_v63, 4 }
  0x2e   :  { %v365_v14 = vor.u32 %v364_v1, %v361_v0  ;;  %v370_v15 = vrot.slane %v368_v3, 5  ;;  %v373_v17 = vrot.slane %v371_v8, 6  ;;  %v382_v19 = vshrl.u32 %v1440_v2, 16  ;;  %v718_v8 = vld [vmem:[#allocation2] sm:$0xf] }
  0x2f   :  { %v352_v16 = vrot.slane %v351_v7, 4  ;;  %v378_v18 = vor.u32 %v377_v47, %v376_v9  ;;  %1160 = vmatmul.mubr.msk.bf16.vlgmr.msra.gmra.mxu0 %vm118_vm1, %v1454_v12  ;;  %v385_v23 = vshll.u32 %v1440_v2, 16  ;;  %v1077_v25 = vrot.slane %v1408_v39, 9 }
  0x30   :  { %v366_v22 = vsel %vm1449_vm11, %v357_v13, %v365_v14  ;;  %v257_v26 = vrot.slane %v1358_v4, 5  ;;  %1170 = vmatpush3.bf16.msra.mxu0 %v284_v38  ;;  %v374_v28 = vor.u32 %v373_v17, %v370_v15  ;;  %v384_v31 = vrot.slane %v382_v19, 5  ;;  %v924_v14 = vld [vmem:[#allocation4 + $0x4] sm:$0xf] }
  0x31   :  { %v356_v27 = vsel %vm1449_vm11, %v352_v16, %v355_v63  ;;  %v380_v29 = vrot.slane %v378_v18, 4  ;;  %v387_v34 = vrot.slane %v385_v23, 6  ;;  %1239 = vmatprep.subr.msk.bf16.mxu0 %vm125_vm0, %v1091_v21  ;;  %v267_v37 = vrot.slane %v1387_v24, 5  ;;  %v920_v16 = vld [vmem:[#allocation4] sm:$0xf] }
  0x32   :  { %v1478_v33 = vcombine.low %v356_v27, %v366_v22  ;;  %v258_v35 = vsel %vm1459_vm12, %v1077_v25, %v257_v26  ;;  %v259_v36 = vrot.slane %v257_v26, 4  ;;  %v375_v38 = vrot.slane %v374_v28, 4 }
  0x33   :  { %v1078_v39 = vrot.slane %v1425_v53, 9  ;;  %v264_v40 = vrot.slane %v1368_v10, 5  ;;  %v388_v42 = vor.u32 %v387_v34, %v384_v31  ;;  %v557_v24 = vsel %vm125_vm0, %v1096_v54, 0 }
  0x34   :  { %1177 = vmatprep.mubr.msk.bf16.mxu1 %vm118_vm1, %v1478_v33  ;;  %v261_v43 = vsel %vm1459_vm12, %v259_v36, %v260_v30  ;;  %v1089_v45 = vrot.slane %v460_v32, 10  ;;  %v379_v46 = vsel %vm1449_vm11, %v375_v38, %v378_v18  ;;  %v471_v30 = vrot.slane %v1358_v4, 6 }
  0x35   :  { %v1080_v47 = vcombine.low %v258_v35, %v261_v43  ;;  %v265_v48 = vsel %vm1459_vm12, %v1078_v39, %v264_v40  ;;  %v266_v49 = vrot.slane %v264_v40, 4  ;;  %v389_v11 = vsel %vm1449_vm11, %v380_v29, %v388_v42 }
  0x36   :  { %v474_v51 = vrot.slane %v1415_v44, 6  ;;  %v1090_v52 = vrot.slane %v461_v41, 10  ;;  %v1086_v53 = vcombine.low %v379_v46, %v389_v11  ;;  %v478_v55 = vrot.slane %v1368_v10, 6  ;;  %v553_v44 = vld [vmem:[%s1600_s2] sm:$0xf] }
  0x37   :  { %1171 = vmatprep.mubr.msk.bf16.mxu0 %vm118_vm1, %v1080_v47  ;;  %v268_v54 = vsel %vm1459_vm12, %v266_v49, %v267_v37  ;;  %v481_v56 = vrot.slane %v1440_v2, 6  ;;  %v498_v58 = vsel %vm125_vm0, %v1091_v21, 0  ;;  %v472_v60 = vsel %vm1502_vm13, %v1089_v45, %v471_v30  ;;  %v1101_v10 = vld [vmem:[%s1600_s2 + $0x8] sm:$0xf] }
  0x38   :  { %v1081_v57 = vcombine.low %v265_v48, %v268_v54  ;;  %v473_v4 = vrot.slane %v471_v30, 4  ;;  %1178 = vmatmul.mubr.msk.bf16.vlgmr.msra.gmra.mxu1 %vm118_vm1, %v1086_v53  ;;  %v480_v61 = vrot.slane %v478_v55, 4  ;;  %v479_v0 = vsel %vm1502_vm13, %v1090_v52, %v478_v55  ;;  %v1111_v52 = vld [vmem:[%s1603_s5 + $0x1] ss:$0 sm:$0xff] }
  0x39   :  { %1188 = vmatpush3.bf16.msra.mxu1 %v557_v24  ;;  %1189 = vmatprep.mubr.msk.bf16.mxu1 %vm118_vm1, %v1080_v47  ;;  %v663_v3 = vsel %vm125_vm0, %v1101_v10, 0  ;;  %v609_v5 = vsel %vm125_vm0, %v553_v44, 0  ;;  %v722_v7 = vsel %vm125_vm0, %v720_v6, 0  ;;  %v774_v9 = vsel %vm125_vm0, %v718_v8, 0 }
  0x3a   :  { %1172 = vmatmul.mubr.msk.bf16.vlgmr.msra.gmra.mxu0 %vm118_vm1, %v1081_v57  ;;  %v475_v62 = vsel %vm1502_vm13, %v473_v4, %v474_v51  ;;  %v482_v1 = vsel %vm1502_vm13, %v480_v61, %v481_v56  ;;  %1242 = vmatprep.subr.msk.bf16.mxu1 %vm125_vm0, %v1101_v10  ;;  %v932_v15 = vsel %vm125_vm0, %v924_v14, 0  ;;  %v990_v17 = vsel %vm125_vm0, %v920_v16, 0 }
  0x3b   :  { %1182 = vmatpush3.bf16.msra.mxu0 %v498_v58  ;;  %v1092_v63 = vcombine.low %v472_v60, %v475_v62  ;;  %v1093_v2 = vcombine.low %v479_v0, %v482_v1 }
  0x3c   :  { %1241 = vmatprep.subr.msk.bf16.mxu0 %vm125_vm0, %v553_v44 }
  0x3d   :  { %1183 = vmatprep.mubr.msk.bf16.mxu0 %vm118_vm1, %v1092_v63 }
  0x40   :  { %1190 = vmatmul.mubr.msk.bf16.vlgmr.msra.gmra.mxu1 %vm118_vm1, %v1081_v57 }
  0x41   :  { %1200 = vmatpush3.bf16.msra.mxu1 %v663_v3  ;;  %1201 = vmatprep.mubr.msk.bf16.mxu1 %vm118_vm1, %v1478_v33 }
  0x42   :  { %1184 = vmatmul.mubr.msk.bf16.vlgmr.msra.gmra.mxu0 %vm118_vm1, %v1093_v2  ;;  %1244 = vmatprep.subr.msk.bf16.mxu1 %vm125_vm0, %v718_v8 }
  0x43   :  { %1194 = vmatpush3.bf16.msra.mxu0 %v609_v5  ;;  %1195 = vmatprep.mubr.msk.bf16.mxu0 %vm118_vm1, %v1435_v59 }
  0x44   :  { %1243 = vmatprep.subr.msk.bf16.mxu0 %vm125_vm0, %v720_v6 }
  0x48   :  { %1202 = vmatmul.mubr.msk.bf16.vlgmr.msra.gmra.mxu1 %vm118_vm1, %v1086_v53 }
  0x49   :  { %1213 = vmatprep.mubr.msk.bf16.mxu1 %vm118_vm1, %v1435_v59  ;;  %1212 = vmatpush3.bf16.msra.mxu1 %v774_v9  ;;  %v826_v59 = vld [vmem:[#allocation2 + $0x8] sm:$0xf] }
  0x4a   :  { %1196 = vmatmul.mubr.msk.bf16.vlgmr.msra.gmra.mxu0 %vm118_vm1, %v1454_v12  ;;  %v828_v13 = vsel %vm125_vm0, %v826_v59, 0  ;;  %1246 = vmatprep.subr.msk.bf16.mxu1 %vm125_vm0, %v924_v14 }
  0x4b   :  { %1207 = vmatprep.mubr.msk.bf16.mxu0 %vm118_vm1, %v1080_v47  ;;  %1206 = vmatpush3.bf16.msra.mxu0 %v722_v7 }
  0x4c   :  { %1245 = vmatprep.subr.msk.bf16.mxu0 %vm125_vm0, %v826_v59 }
  0x50   :  { %1214 = vmatmul.mubr.msk.bf16.vlgmr.msra.gmra.mxu1 %vm118_vm1, %v1454_v12 }
  0x51   :  { %1224 = vmatpush3.bf16.msra.mxu1 %v932_v15 }
  0x52   :  { %1208 = vmatmul.mubr.msk.bf16.vlgmr.msra.gmra.mxu0 %vm118_vm1, %v1081_v57 }
  0x53   :  { %1219 = vmatprep.mubr.msk.bf16.mxu0 %vm118_vm1, %v1478_v33  ;;  %1218 = vmatpush3.bf16.msra.mxu0 %v828_v13 }
  0x54   :  { %1247 = vmatprep.subr.msk.bf16.mxu0 %vm125_vm0, %v920_v16 }
  0x5a   :  { %1220 = vmatmul.mubr.msk.bf16.vlgmr.msra.gmra.mxu0 %vm118_vm1, %v1086_v53 }
  0x5b   :  { %1230 = vmatpush3.bf16.msra.mxu0 %v990_v17  ;;  %v1110_v17 = vld [vmem:[%s1603_s5] ss:$0 sm:$0xff] }
  0xe1   :  { %v1167_v18 = vpop.f32.mrf.mxu1 }
  0xe3   :  { %v231_v19 = vpop.f32.mrf.mxu1 }
  0xe5   :  { %v1168_v21 = vpop.f32.mrf.mxu1 }
  0xe7   :  { %v234_v23 = vpop.f32.mrf.mxu1 }
  0xef   :  { %v1161_v20 = vpop.f32.mrf.mxu0 }
  0xf0   :  { %v240_v33 = vadd.f32 %v1167_v18, %v1161_v20 }
  0xf1   :  { %v163_v22 = vpop.f32.mrf.mxu0 }
  0xf2   :  { %v232_v31 = vadd.f32 %v231_v19, %v163_v22 }
  0xf3   :  { %v1162_v12 = vpop.f32.mrf.mxu0 }
  0xf4   :  { %v243_v35 = vadd.f32 %v1168_v21, %v1162_v12 }
  0xf5   :  { %v166_v25 = vpop.f32.mrf.mxu0 }
  0xf6   :  { %v235_v40 = vadd.f32 %v234_v23, %v166_v25 }
  0xf8   :  { %v1179_v26 = vpop.f32.mrf.mxu1 }
  0xfa   :  { %v1173_v27 = vpop.f32.mrf.mxu0  ;;  %v441_v28 = vpop.f32.mrf.mxu1 }
  0xfb   :  { %v337_v38 = vadd.f32 %v1173_v27, %v240_v33 }
  0xfc   :  { %v320_v29 = vpop.f32.mrf.mxu0  ;;  %v1180_v32 = vpop.f32.mrf.mxu1 }
  0xfd   :  { %v335_v36 = vadd.f32 %v320_v29, %v232_v31  ;;  %v458_v47 = vadd.f32 %v1179_v26, %v337_v38 }
  0xfe   :  { %v1174_v34 = vpop.f32.mrf.mxu0  ;;  %v444_v37 = vpop.f32.mrf.mxu1 }
  0xff   :  { %v338_v41 = vadd.f32 %v1174_v34, %v243_v35  ;;  %v456_v46 = vadd.f32 %v441_v28, %v335_v36 }
 0x100   :  { %v323_v39 = vpop.f32.mrf.mxu0  ;;  %v1191_v42 = vpop.f32.mrf.mxu1 }
 0x101   :  { %v336_v24 = vadd.f32 %v323_v39, %v235_v40  ;;  %v459_v11 = vadd.f32 %v1180_v32, %v338_v41 }
 0x102   :  { %v1185_v43 = vpop.f32.mrf.mxu0  ;;  %v593_v45 = vpop.f32.mrf.mxu1 }
 0x103   :  { %v551_v30 = vadd.f32 %v1185_v43, %v458_v47  ;;  %v457_v55 = vadd.f32 %v444_v37, %v336_v24 }
 0x104   :  { %v534_v48 = vpop.f32.mrf.mxu0  ;;  %v1192_v49 = vpop.f32.mrf.mxu1 }
 0x105   :  { %v549_v50 = vadd.f32 %v534_v48, %v456_v46  ;;  %v903_v44 = vadd.f32 %v1111_v52, %v551_v30 }
 0x106   :  { %v1186_v51 = vpop.f32.mrf.mxu0  ;;  %v596_v53 = vpop.f32.mrf.mxu1 }
 0x107   :  { %v552_v54 = vadd.f32 %v1186_v51, %v459_v11  ;;  %v901_v57 = vadd.f32 %v1111_v52, %v549_v50  ;;  %v907_v6 = vmax.f32 %v903_v44, 0.0  ;;  %v1112_v11 = vld [vmem:[%s1603_s5 + $0x2] ss:$0 sm:$0xff] }
 0x108   :  { %v537_v56 = vpop.f32.mrf.mxu0  ;;  %v1203_v60 = vpop.f32.mrf.mxu1 }
 0x109   :  { %v904_v58 = vadd.f32 %v1111_v52, %v552_v54  ;;  %v550_v4 = vadd.f32 %v537_v56, %v457_v55  ;;  %v905_v2 = vmax.f32 %v901_v57, 0.0 }
 0x10a   :  { %v1197_v61 = vpop.f32.mrf.mxu0  ;;  %v699_v62 = vpop.f32.mrf.mxu1 }
 0x10b   :  { %v902_v10 = vadd.f32 %v1111_v52, %v550_v4  ;;  %v908_v63 = vmax.f32 %v904_v58, 0.0  ;;  %v654_v0 = vadd.f32 %v1197_v61, %v1191_v42  ;;  %v1117_v52 = vld [vmem:[%s1603_s5 + $0x3] ss:$0 sm:$0xff] }
 0x10c   :  { %v645_v1 = vpop.f32.mrf.mxu0  ;;  %v1204_v7 = vpop.f32.mrf.mxu1 }
 0x10d   :  { %v906_v3 = vmax.f32 %v902_v10, 0.0  ;;  %v646_v5 = vadd.f32 %v645_v1, %v593_v45  ;;  %v922_v14 = vpack.c.bf16 %v908_v63, %v907_v6  ;;  %v716_v15 = vadd.f32 %v1203_v60, %v654_v0 }
 0x10e   :  { %v1198_v8 = vpop.f32.mrf.mxu0  ;;  %v702_v20 = vpop.f32.mrf.mxu1 }
 0x10f   :  { %v921_v9 = vpack.c.bf16 %v906_v3, %v905_v2  ;;  %v714_v59 = vadd.f32 %v699_v62, %v646_v5  ;;  %v657_v13 = vadd.f32 %v1198_v8, %v1192_v49  ;;  %v890_v23 = vadd.f32 %v1110_v17, %v716_v15 }
 0x110   :  { %v648_v16 = vpop.f32.mrf.mxu0  ;;  %v1215_v36 = vpop.f32.mrf.mxu1 }
 0x111   :  { %v717_v18 = vadd.f32 %v1204_v7, %v657_v13  ;;  %v649_v19 = vadd.f32 %v648_v16, %v596_v53  ;;  %1225 = vmatprep.mubr.msk.bf16.mxu1 %vm118_vm1, %v921_v9  ;;  %v888_v21 = vadd.f32 %v1110_v17, %v714_v59  ;;  %v894_v29 = vmax.f32 %v890_v23, 0.0 }
 0x112   :  { %1226 = vmatmul.mubr.msk.bf16.vlgmr.msra.gmra.mxu1 %vm118_vm1, %v922_v14  ;;  %v1209_v33 = vpop.f32.mrf.mxu0  ;;  %v810_v38 = vpop.f32.mrf.mxu1 }
 0x113   :  { %v891_v22 = vadd.f32 %v1110_v17, %v717_v18  ;;  %v715_v12 = vadd.f32 %v702_v20, %v649_v19  ;;  %v892_v27 = vmax.f32 %v888_v21, 0.0  ;;  %v819_v45 = vadd.f32 %v1215_v36, %v1209_v33 }
 0x114   :  { %v758_v34 = vpop.f32.mrf.mxu0  ;;  %v1216_v40 = vpop.f32.mrf.mxu1 }
 0x115   :  { %v889_v25 = vadd.f32 %v1110_v17, %v715_v12  ;;  %v895_v26 = vmax.f32 %v891_v22, 0.0  ;;  %v811_v46 = vadd.f32 %v810_v38, %v758_v34 }
 0x116   :  { %v1210_v35 = vpop.f32.mrf.mxu0  ;;  %v813_v42 = vpop.f32.mrf.mxu1 }
 0x117   :  { %v893_v28 = vmax.f32 %v889_v25, 0.0  ;;  %v919_v32 = vpack.c.bf16 %v895_v26, %v894_v29  ;;  %v822_v47 = vadd.f32 %v1216_v40, %v1210_v35 }
 0x118   :  { %v761_v37 = vpop.f32.mrf.mxu0 }
 0x119   :  { %v918_v31 = vpack.c.bf16 %v893_v28, %v892_v27  ;;  %v814_v53 = vadd.f32 %v813_v42, %v761_v37 }
 0x11a   :  { %v1221_v39 = vpop.f32.mrf.mxu0 }
 0x11b   :  { %1231 = vmatprep.mubr.msk.bf16.mxu0 %vm118_vm1, %v918_v31  ;;  %v881_v50 = vadd.f32 %v1221_v39, %v819_v45 }
 0x11c   :  { %1232 = vmatmul.mubr.msk.bf16.vlgmr.msra.gmra.mxu0 %vm118_vm1, %v919_v32  ;;  %v864_v41 = vpop.f32.mrf.mxu0 }
 0x11d   :  { %v879_v30 = vadd.f32 %v864_v41, %v811_v46  ;;  %v916_v58 = vadd.f32 %v1112_v11, %v881_v50 }
 0x11e   :  { %v1222_v43 = vpop.f32.mrf.mxu0 }
 0x11f   :  { %v882_v55 = vadd.f32 %v1222_v43, %v822_v47  ;;  %v914_v44 = vadd.f32 %v1112_v11, %v879_v30 }
 0x120   :  { %v867_v48 = vpop.f32.mrf.mxu0 }
 0x121   :  { %v880_v10 = vadd.f32 %v867_v48, %v814_v53  ;;  %v917_v1 = vadd.f32 %v1112_v11, %v882_v55 }
 0x123   :  { %v915_v9 = vadd.f32 %v1112_v11, %v880_v10 }
 0x1d2   :  { %v1227_v24 = vpop.f32.mrf.mxu1 }
 0x1d4   :  { %v968_v49 = vpop.f32.mrf.mxu1 }
 0x1d6   :  { %v1228_v56 = vpop.f32.mrf.mxu1 }
 0x1d8   :  { %v971_v2 = vpop.f32.mrf.mxu1 }
 0x1dc   :  { %v1233_v51 = vpop.f32.mrf.mxu0 }
 0x1dd   :  { %v1035_v54 = vadd.f32 %v1233_v51, %v1227_v24 }
 0x1de   :  { %v1026_v57 = vpop.f32.mrf.mxu0 }
 0x1df   :  { %v1048_v60 = vadd.f32 %v1117_v52, %v1035_v54  ;;  %v1027_v4 = vadd.f32 %v1026_v57, %v968_v49 }
 0x1e0   :  { %v1234_v61 = vpop.f32.mrf.mxu0 }
 0x1e1   :  { %v1052_v62 = vadd.f32 %v1048_v60, %v916_v58  ;;  %v1046_v63 = vadd.f32 %v1117_v52, %v1027_v4  ;;  %v1038_v0 = vadd.f32 %v1234_v61, %v1228_v56 }
 0x1e2   :  { %v1029_v3 = vpop.f32.mrf.mxu0 }
 0x1e3   :  { %v1056_v5 = vmax.f32 %v1052_v62, 0.0  ;;  %v1050_v6 = vadd.f32 %v1046_v63, %v914_v44  ;;  %v1049_v7 = vadd.f32 %v1117_v52, %v1038_v0  ;;  %v1030_v8 = vadd.f32 %v1029_v3, %v971_v2 }
 0x1e5   :  { %1060 = vst.msk [vmem:[%s1604_s6 + $0x10] sm:$0xff] %vm118_vm1, %v1056_v5  ;;  %v1054_v59 = vmax.f32 %v1050_v6, 0.0  ;;  %v1053_v13 = vadd.f32 %v1049_v7, %v917_v1  ;;  %v1047_v14 = vadd.f32 %v1117_v52, %v1030_v8 }
 0x1e7   :  { %1058 = vst.msk [vmem:[%s1604_s6] sm:$0xff] %vm118_vm1, %v1054_v59  ;;  %v1057_v15 = vmax.f32 %v1053_v13, 0.0  ;;  %v1051_v16 = vadd.f32 %v1047_v14, %v915_v9 }
 0x1e9   :  { %1061 = vst.msk [vmem:[%s1604_s6 + $0x18] sm:$0xff] %vm118_vm1, %v1057_v15  ;;  %v1055_v17 = vmax.f32 %v1051_v16, 0.0 }
 0x1eb   :  { %1059 = vst.msk [vmem:[%s1604_s6 + $0x8] sm:$0xff] %vm118_vm1, %v1055_v17 }
 0x1ec   :  { %1066 = vsyncpa [#allocation3], 1 }
 0x1ed   :  { %1067 = vsyncpa [#allocation5], 1 }

</bundles_post_ra>
